<compile_context>
chip_gen: v7x
topology: tpu7x:2x2x1
jax: 0.10.0
libtpu: 0.0.40
codegen_flags: <defaults>
</compile_context>

<pallas_src>
import functools

import jax
import jax.numpy as jnp
from jax.experimental import pallas as pl
from jax.experimental.pallas import tpu as pltpu

NEG_SLOPE = 0.01  # torch.nn.LeakyReLU default negative_slope


def _round_up(x: int, m: int) -> int:
    return ((x + m - 1) // m) * m


def _leaky_relu(x):
    return jnp.where(x > 0, x, jnp.float32(NEG_SLOPE) * x)


def tte_generator_kernel(
    # streamed per-batch-tile inputs (feature-major: batch on lanes)
    xt_ref,     # (F_p, TB) f32   X^T tile
    nz_ref,     # (L_p, TB) f32   noise^T tile
    # VMEM-resident weights (constant index_map across the batch grid)
    w1z_ref,    # (H_p, Z_p)  bf16   Linear(F+L -> H) acting on z=[X|noise]
    b1_ref,     # (H_p, 1)    f32
    w2h_ref,    # (H1_p, H_p) bf16   Linear(H+F+L -> H+F+L), h1 columns
    w2z_ref,    # (H1_p, Z_p) bf16   Linear(H+F+L -> H+F+L), [X|noise] columns
    b2_ref,     # (H1_p, 1)   f32
    w3h2_ref,   # (H1_p, 1)   f32    output-layer columns (split over a2)
    w3h1_ref,   # (H_p, 1)    f32
    w3z_ref,    # (Z_p, 1)    f32
    b3_ref,     # (1, 1)      f32
    # output
    out_ref,    # (1, TB)     f32    lane-dense
):
    # z = hstack([X, noise]) realised as a sublane concat (cheap, 8-aligned).
    zt = jnp.concatenate([xt_ref[...], nz_ref[...]], axis=0)       # (Z_p, TB) f32
    zt_b = zt.astype(jnp.bfloat16)

    # ---- hidden layer 1: ResidualLayer(F+L -> H), bf16 MXU / f32 acc ------
    pre1 = jnp.dot(w1z_ref[...], zt_b,
                   preferred_element_type=jnp.float32) + b1_ref[...]
    h1 = _leaky_relu(pre1)                                          # (H_p, TB) f32
    h1_b = h1.astype(jnp.bfloat16)

    # ---- hidden layer 2: ResidualLayer(H+F+L -> H+F+L) --------------------
    # a1 = concat([h1, X, noise]) realised via the fused weight split.
    pre2 = (jnp.dot(w2h_ref[...], h1_b, preferred_element_type=jnp.float32)
            + jnp.dot(w2z_ref[...], zt_b, preferred_element_type=jnp.float32)
            + b2_ref[...])
    h2 = _leaky_relu(pre2)                                          # (H1_p, TB) f32

    # ---- output layer: Linear(2*(H+F+L) -> 1) -----------------------------
    # a2 = concat([h2, h1, X, noise]); one output feature, so VPU multiplies
    # + cross-sublane (XLU) reductions instead of N=1 MXU matmuls. Kept f32.
    out = (jnp.sum(h2 * w3h2_ref[...], axis=0, keepdims=True)
           + jnp.sum(h1 * w3h1_ref[...], axis=0, keepdims=True)
           + jnp.sum(zt * w3z_ref[...], axis=0, keepdims=True)
           + b3_ref[...])
    out_ref[...] = out.astype(out_ref.dtype)                        # (1, TB)


def init_generator_params(key, n_features, n_units_latent, n_units_hidden):
    """Synthetic weights in torch Linear layout + fused/padded kernel params."""
    F, L, H = n_features, n_units_latent, n_units_hidden
    D0 = F + L
    H1 = H + D0
    IN3 = 2 * H1

    ks = jax.random.split(key, 6)
    scale = 0.1
    # torch nn.Linear stores W as (out_features, in_features).
    w1 = scale * jax.random.normal(ks[0], (H, D0), jnp.float32)    # Linear(D0 -> H)
    b1 = scale * jax.random.normal(ks[1], (H,), jnp.float32)
    w2 = scale * jax.random.normal(ks[2], (H1, H1), jnp.float32)   # Linear(H1 -> H1)
    b2 = scale * jax.random.normal(ks[3], (H1,), jnp.float32)
    w3 = scale * jax.random.normal(ks[4], (1, IN3), jnp.float32)   # Linear(2*H1 -> 1)
    b3 = scale * jax.random.normal(ks[5], (1,), jnp.float32)
    full = dict(w1=w1, b1=b1, w2=w2, b2=b2, w3=w3, b3=b3)

    F_p, L_p, H_p, H1_p = (_round_up(F, 8), _round_up(L, 8),
                           _round_up(H, 8), _round_up(H1, 8))
    Z_p = F_p + L_p

    def pad2(a, rows, cols, dtype=jnp.float32):
        out = jnp.zeros((rows, cols), jnp.float32)
        out = out.at[: a.shape[0], : a.shape[1]].set(a)
        return out.astype(dtype)

    def fuse_z(wx, wn, rows, dtype):
        # Columns 0..F act on X rows of zt, columns F_p..F_p+L act on noise
        # rows of zt; everything else is zero padding (mathematically inert).
        out = jnp.zeros((rows, Z_p), jnp.float32)
        out = out.at[: wx.shape[0], :F].set(wx)
        out = out.at[: wn.shape[0], F_p:F_p + L].set(wn)
        return out.astype(dtype)

    # output-layer column for the [X | noise] rows of zt
    w3z = jnp.zeros((Z_p, 1), jnp.float32)
    w3z = w3z.at[:F, 0].set(w3[0, H1 + H:H1 + H + F])
    w3z = w3z.at[F_p:F_p + L, 0].set(w3[0, H1 + H + F:])

    params = dict(
        # layer 1: acts on z = [X | noise]  (bf16 for the MXU)
        w1z=fuse_z(w1[:, :F], w1[:, F:], H_p, jnp.bfloat16),
        b1=pad2(b1.reshape(H, 1), H_p, 1),
        # layer 2: acts on concat([h1, X, noise])  (bf16 for the MXU)
        w2h=pad2(w2[:, :H], H1_p, H_p, jnp.bfloat16),
        w2z=fuse_z(w2[:, H:H + F], w2[:, H + F:], H1_p, jnp.bfloat16),
        b2=pad2(b2.reshape(H1, 1), H1_p, 1),
        # output layer: columns for the VPU-multiply + sublane-reduce path (f32)
        w3h2=pad2(w3[:, :H1].T, H1_p, 1),
        w3h1=pad2(w3[:, H1:H1 + H].T, H_p, 1),
        w3z=w3z,
        b3=b3.reshape(1, 1).astype(jnp.float32),
    )
    return params, full


@functools.partial(
    jax.jit,
    static_argnames=("n_features", "n_units_latent", "n_units_hidden",
                     "block_batch"),
)
def time_event_gan_forward(X, noise_key, params, *, n_features, n_units_latent,
                           n_units_hidden, block_batch=2048):
    """Mirrors TimeEventGAN.forward: draw noise, hstack, run the residual MLP.

    Returns (T_pred, noise) so callers can verify against the exact noise draw.
    """
    F, L, H = n_features, n_units_latent, n_units_hidden
    H1 = H + F + L
    F_p, L_p, H_p, H1_p = (_round_up(F, 8), _round_up(L, 8),
                           _round_up(H, 8), _round_up(H1, 8))
    Z_p = F_p + L_p

    B = X.shape[0]
    # Exact N(0,1) draw (== torch.randn semantics), reproducible regardless of
    # tile size; streamed into the kernel instead of in-kernel PRNG.
    noise = jax.random.normal(noise_key, (B, L), jnp.float32)

    # Batch tile: multiple of 128, large by default, and (for large B) chosen
    # so the grid has >= 2 steps -> both v7x TensorCores get work.
    block_batch = max(128, _round_up(block_batch, 128))
    half = _round_up(-(-B // 2), 128)
    TB = min(block_batch, max(128, half))
    B_pad = _round_up(B, TB)
    n_tiles = B_pad // TB

    # Lane-dense layout: batch on the lane (last) axis.
    xt = jnp.zeros((F_p, B_pad), jnp.float32).at[:F, :B].set(
        X.astype(jnp.float32).T)
    nzt = jnp.zeros((L_p, B_pad), jnp.float32).at[:L, :B].set(noise.T)

    const = lambda i: (0, 0)       # VMEM-resident weights
    bcol = lambda i: (0, i)        # streamed over batch tiles

    in_specs = [
        pl.BlockSpec((F_p, TB), bcol),        # X^T tile
        pl.BlockSpec((L_p, TB), bcol),        # noise^T tile
        pl.BlockSpec((H_p, Z_p), const),      # w1z (bf16)
        pl.BlockSpec((H_p, 1), const),        # b1
        pl.BlockSpec((H1_p, H_p), const),     # w2h (bf16)
        pl.BlockSpec((H1_p, Z_p), const),     # w2z (bf16)
        pl.BlockSpec((H1_p, 1), const),       # b2
        pl.BlockSpec((H1_p, 1), const),       # w3h2
        pl.BlockSpec((H_p, 1), const),        # w3h1
        pl.BlockSpec((Z_p, 1), const),        # w3z
        pl.BlockSpec((1, 1), const),          # b3
    ]
    out_spec = pl.BlockSpec((1, TB), bcol)

    # Size the scoped-VMEM cap from the actual footprint (never the full
    # physical VMEM — v7x only has 64 MiB per TensorCore).
    weight_bytes = (2 * (H_p * Z_p + H1_p * H_p + H1_p * Z_p)          # bf16 W
                    + 4 * (H_p + 2 * H1_p + H_p + Z_p + 1))            # f32 b/w3
    io_bytes = 2 * 4 * TB * (F_p + L_p + 1)                            # dbl-buffered tiles
    act_bytes = 4 * TB * (Z_p + H_p + H1_p) + 2 * TB * (Z_p + H_p)     # temporaries
    vmem_limit = int(min(max(2 * (weight_bytes + io_bytes + act_bytes),
                             20 * 1024 * 1024),
                         48 * 1024 * 1024))

    out = pl.pallas_call(
        tte_generator_kernel,
        out_shape=jax.ShapeDtypeStruct((1, B_pad), jnp.float32),
        grid=(n_tiles,),
        in_specs=in_specs,
        out_specs=out_spec,
        compiler_params=pltpu.CompilerParams(
            dimension_semantics=("parallel",),   # batch tiles are independent
            vmem_limit_bytes=vmem_limit,
        ),
    )(xt, nzt,
      params["w1z"], params["b1"],
      params["w2h"], params["w2z"], params["b2"],
      params["w3h2"], params["w3h1"], params["w3z"], params["b3"])

    T_pred = out[0, :B].reshape(B, 1)
    return T_pred, noise


def reference_forward(z, full):
    """Pure-JAX reference of the PyTorch residual MLP, mirroring the kernel's
    bf16-operand / f32-accumulate MXU numerics for the two hidden layers."""
    def mm(a, w):  # torch Linear: a @ w.T
        return jnp.dot(a.astype(jnp.bfloat16), w.T.astype(jnp.bfloat16),
                       preferred_element_type=jnp.float32)

    h1 = _leaky_relu(mm(z, full["w1"]) + full["b1"])
    a1 = jnp.concatenate([h1, z], axis=-1)
    h2 = _leaky_relu(mm(a1, full["w2"]) + full["b2"])
    a2 = jnp.concatenate([h2, a1], axis=-1)
    return a2 @ full["w3"].T + full["b3"]          # output layer stays f32


if __name__ == "__main__":
    # Small, module-consistent shapes.
    B = 8
    n_features = 6
    n_units_latent = 4
    n_units_hidden = 32      # scaled-down from the synthcity default of 250

    root = jax.random.PRNGKey(0)
    k_x, k_w, k_n = jax.random.split(root, 3)

    X = jax.random.normal(k_x, (B, n_features), jnp.float32)
    params, full = init_generator_params(k_w, n_features, n_units_latent,
                                         n_units_hidden)

    T_pred, noise = time_event_gan_forward(
        X, k_n, params,
        n_features=n_features, n_units_latent=n_units_latent,
        n_units_hidden=n_units_hidden, block_batch=2048)
    T_pred = jax.block_until_ready(T_pred)

    # Verify against a pure-JAX reference of the residual MLP using the exact
    # noise draw the kernel consumed (forward() draws fresh randn each call,
    # so only the network math has to match).
    Z = jnp.concatenate([X, noise], axis=1)          # torch.hstack([X, noise])
    ref = reference_forward(Z, full)
    assert T_pred.shape == (B, 1), T_pred.shape
    assert bool(jnp.allclose(T_pred, ref, atol=5e-3, rtol=5e-3)), (T_pred, ref)

    print("KERNEL_OK")
</pallas_src>

<mosaic_0001>
module attributes {stable_mosaic.version = 11 : i64} {
  func.func @tte_generator_kernel(%arg0: i32, %arg1: memref<8x128xf32, #tpu.memory_space<vmem>>, %arg2: memref<8x128xf32, #tpu.memory_space<vmem>>, %arg3: memref<32x16xbf16, #tpu.memory_space<vmem>>, %arg4: memref<32x1xf32, #tpu.memory_space<vmem>>, %arg5: memref<48x32xbf16, #tpu.memory_space<vmem>>, %arg6: memref<48x16xbf16, #tpu.memory_space<vmem>>, %arg7: memref<48x1xf32, #tpu.memory_space<vmem>>, %arg8: memref<48x1xf32, #tpu.memory_space<vmem>>, %arg9: memref<32x1xf32, #tpu.memory_space<vmem>>, %arg10: memref<16x1xf32, #tpu.memory_space<vmem>>, %arg11: memref<1x1xf32, #tpu.memory_space<vmem>>, %arg12: memref<1x128xf32, #tpu.memory_space<vmem>>) attributes {dimension_semantics = [#tpu.dimension_semantics<parallel>], iteration_bounds = array<i64: 1>, scalar_prefetch = 0 : i64, scratch_operands = 0 : i64, tpu.core_type = #tpu.core_type<tc>, window_params = [{transform_indices = @transform_0, window_bounds = array<i64: 8, 128>}, {transform_indices = @transform_1, window_bounds = array<i64: 8, 128>}, {pipeline_mode = #tpu.pipeline_mode<synchronous>, transform_indices = @transform_2, window_bounds = array<i64: 32, 16>}, {pipeline_mode = #tpu.pipeline_mode<synchronous>, transform_indices = @transform_3, window_bounds = array<i64: 32, 1>}, {pipeline_mode = #tpu.pipeline_mode<synchronous>, transform_indices = @transform_4, window_bounds = array<i64: 48, 32>}, {pipeline_mode = #tpu.pipeline_mode<synchronous>, transform_indices = @transform_5, window_bounds = array<i64: 48, 16>}, {pipeline_mode = #tpu.pipeline_mode<synchronous>, transform_indices = @transform_6, window_bounds = array<i64: 48, 1>}, {pipeline_mode = #tpu.pipeline_mode<synchronous>, transform_indices = @transform_7, window_bounds = array<i64: 48, 1>}, {pipeline_mode = #tpu.pipeline_mode<synchronous>, transform_indices = @transform_8, window_bounds = array<i64: 32, 1>}, {pipeline_mode = #tpu.pipeline_mode<synchronous>, transform_indices = @transform_9, window_bounds = array<i64: 16, 1>}, {pipeline_mode = #tpu.pipeline_mode<synchronous>, transform_indices = @transform_10, window_bounds = array<i64: 1, 1>}, {transform_indices = @transform_11, window_bounds = array<i64: 1, 128>}]} {
    %c0 = arith.constant 0 : index
    %c0_0 = arith.constant 0 : index
    %0 = vector.load %arg1[%c0, %c0_0] : memref<8x128xf32, #tpu.memory_space<vmem>>, vector<8x128xf32>
    %c0_1 = arith.constant 0 : index
    %c0_2 = arith.constant 0 : index
    %1 = vector.load %arg2[%c0_1, %c0_2] : memref<8x128xf32, #tpu.memory_space<vmem>>, vector<8x128xf32>
    %2 = tpu.concatenate %0, %1 in 0 : vector<8x128xf32>, vector<8x128xf32> -> vector<16x128xf32>
    %3 = arith.truncf %2 : vector<16x128xf32> to vector<16x128xbf16>
    %c0_3 = arith.constant 0 : index
    %c0_4 = arith.constant 0 : index
    %4 = vector.load %arg3[%c0_3, %c0_4] : memref<32x16xbf16, #tpu.memory_space<vmem>>, vector<32x16xbf16>
    %cst = arith.constant dense<0.000000e+00> : vector<32x128xf32>
    %5 = tpu.matmul %4, %3, %cst {dimension_numbers = #tpu.dot_dimension_numbers<[1], [0], [0], [1], [0, 0, 1, 1], [], []>} : vector<32x16xbf16>, vector<16x128xbf16>, vector<32x128xf32> -> vector<32x128xf32>
    %c0_5 = arith.constant 0 : index
    %c0_6 = arith.constant 0 : index
    %6 = vector.load %arg4[%c0_5, %c0_6] : memref<32x1xf32, #tpu.memory_space<vmem>>, vector<32x1xf32>
    %7 = vector.broadcast %6 : vector<32x1xf32> to vector<32x128xf32>
    %8 = arith.addf %5, %7 : vector<32x128xf32>
    %cst_7 = arith.constant 0.000000e+00 : f32
    %9 = vector.broadcast %cst_7 : f32 to vector<32x128xf32>
    %10 = arith.cmpf ogt, %8, %9 : vector<32x128xf32>
    %cst_8 = arith.constant 0.00999999977 : f32
    %11 = vector.broadcast %cst_8 : f32 to vector<32x128xf32>
    %12 = arith.mulf %11, %8 : vector<32x128xf32>
    %13 = arith.select %10, %8, %12 : vector<32x128xi1>, vector<32x128xf32>
    %14 = arith.truncf %13 : vector<32x128xf32> to vector<32x128xbf16>
    %c0_9 = arith.constant 0 : index
    %c0_10 = arith.constant 0 : index
    %15 = vector.load %arg5[%c0_9, %c0_10] : memref<48x32xbf16, #tpu.memory_space<vmem>>, vector<48x32xbf16>
    %cst_11 = arith.constant dense<0.000000e+00> : vector<48x128xf32>
    %16 = tpu.matmul %15, %14, %cst_11 {dimension_numbers = #tpu.dot_dimension_numbers<[1], [0], [0], [1], [0, 0, 1, 1], [], []>} : vector<48x32xbf16>, vector<32x128xbf16>, vector<48x128xf32> -> vector<48x128xf32>
    %c0_12 = arith.constant 0 : index
    %c0_13 = arith.constant 0 : index
    %17 = vector.load %arg6[%c0_12, %c0_13] : memref<48x16xbf16, #tpu.memory_space<vmem>>, vector<48x16xbf16>
    %cst_14 = arith.constant dense<0.000000e+00> : vector<48x128xf32>
    %18 = tpu.matmul %17, %3, %cst_14 {dimension_numbers = #tpu.dot_dimension_numbers<[1], [0], [0], [1], [0, 0, 1, 1], [], []>} : vector<48x16xbf16>, vector<16x128xbf16>, vector<48x128xf32> -> vector<48x128xf32>
    %19 = arith.addf %16, %18 : vector<48x128xf32>
    %c0_15 = arith.constant 0 : index
    %c0_16 = arith.constant 0 : index
    %20 = vector.load %arg7[%c0_15, %c0_16] : memref<48x1xf32, #tpu.memory_space<vmem>>, vector<48x1xf32>
    %21 = vector.broadcast %20 : vector<48x1xf32> to vector<48x128xf32>
    %22 = arith.addf %19, %21 : vector<48x128xf32>
    %cst_17 = arith.constant 0.000000e+00 : f32
    %23 = vector.broadcast %cst_17 : f32 to vector<48x128xf32>
    %24 = arith.cmpf ogt, %22, %23 : vector<48x128xf32>
    %cst_18 = arith.constant 0.00999999977 : f32
    %25 = vector.broadcast %cst_18 : f32 to vector<48x128xf32>
    %26 = arith.mulf %25, %22 : vector<48x128xf32>
    %27 = arith.select %24, %22, %26 : vector<48x128xi1>, vector<48x128xf32>
    %c0_19 = arith.constant 0 : index
    %c0_20 = arith.constant 0 : index
    %28 = vector.load %arg8[%c0_19, %c0_20] : memref<48x1xf32, #tpu.memory_space<vmem>>, vector<48x1xf32>
    %29 = vector.broadcast %28 : vector<48x1xf32> to vector<48x128xf32>
    %30 = arith.mulf %27, %29 : vector<48x128xf32>
    %cst_21 = arith.constant dense<0.000000e+00> : vector<128xf32>
    %31 = vector.multi_reduction <add>, %30, %cst_21 [0] : vector<48x128xf32> to vector<128xf32>
    %32 = vector.shape_cast %31 : vector<128xf32> to vector<1x128xf32>
    %c0_22 = arith.constant 0 : index
    %c0_23 = arith.constant 0 : index
    %33 = vector.load %arg9[%c0_22, %c0_23] : memref<32x1xf32, #tpu.memory_space<vmem>>, vector<32x1xf32>
    %34 = vector.broadcast %33 : vector<32x1xf32> to vector<32x128xf32>
    %35 = arith.mulf %13, %34 : vector<32x128xf32>
    %cst_24 = arith.constant dense<0.000000e+00> : vector<128xf32>
    %36 = vector.multi_reduction <add>, %35, %cst_24 [0] : vector<32x128xf32> to vector<128xf32>
    %37 = vector.shape_cast %36 : vector<128xf32> to vector<1x128xf32>
    %38 = arith.addf %32, %37 : vector<1x128xf32>
    %c0_25 = arith.constant 0 : index
    %c0_26 = arith.constant 0 : index
    %39 = vector.load %arg10[%c0_25, %c0_26] : memref<16x1xf32, #tpu.memory_space<vmem>>, vector<16x1xf32>
    %40 = vector.broadcast %39 : vector<16x1xf32> to vector<16x128xf32>
    %41 = arith.mulf %2, %40 : vector<16x128xf32>
    %cst_27 = arith.constant dense<0.000000e+00> : vector<128xf32>
    %42 = vector.multi_reduction <add>, %41, %cst_27 [0] : vector<16x128xf32> to vector<128xf32>
    %43 = vector.shape_cast %42 : vector<128xf32> to vector<1x128xf32>
    %44 = arith.addf %38, %43 : vector<1x128xf32>
    %c0_28 = arith.constant 0 : index
    %c0_29 = arith.constant 0 : index
    %45 = vector.load %arg11[%c0_28, %c0_29] : memref<1x1xf32, #tpu.memory_space<vmem>>, vector<1x1xf32>
    %46 = vector.broadcast %45 : vector<1x1xf32> to vector<1x128xf32>
    %47 = arith.addf %44, %46 : vector<1x128xf32>
    %c0_30 = arith.constant 0 : index
    %c0_31 = arith.constant 0 : index
    %48 = vector.load %arg12[%c0_30, %c0_31] : memref<1x128xf32, #tpu.memory_space<vmem>>, vector<1x128xf32>
    tpu.vector_store %arg12[%c0_30, %c0_31], %47 {strides = array<i32>} : memref<1x128xf32, #tpu.memory_space<vmem>>, vector<1x128xf32>,
    return
  }
  func.func @transform_0(%arg0: i32) -> (i32, i32) {
    %c0_i32 = arith.constant 0 : i32
    %c0_i32_0 = arith.constant 0 : i32
    return %c0_i32, %arg0 : i32, i32
  }
  func.func @transform_1(%arg0: i32) -> (i32, i32) {
    %c0_i32 = arith.constant 0 : i32
    %c0_i32_0 = arith.constant 0 : i32
    return %c0_i32, %arg0 : i32, i32
  }
  func.func @transform_2(%arg0: i32) -> (i32, i32) {
    %c0_i32 = arith.constant 0 : i32
    %c0_i32_0 = arith.constant 0 : i32
    %c0_i32_1 = arith.constant 0 : i32
    return %c0_i32, %c0_i32_0 : i32, i32
  }
  func.func @transform_3(%arg0: i32) -> (i32, i32) {
    %c0_i32 = arith.constant 0 : i32
    %c0_i32_0 = arith.constant 0 : i32
    %c0_i32_1 = arith.constant 0 : i32
    return %c0_i32, %c0_i32_0 : i32, i32
  }
  func.func @transform_4(%arg0: i32) -> (i32, i32) {
    %c0_i32 = arith.constant 0 : i32
    %c0_i32_0 = arith.constant 0 : i32
    %c0_i32_1 = arith.constant 0 : i32
    return %c0_i32, %c0_i32_0 : i32, i32
  }
  func.func @transform_5(%arg0: i32) -> (i32, i32) {
    %c0_i32 = arith.constant 0 : i32
    %c0_i32_0 = arith.constant 0 : i32
    %c0_i32_1 = arith.constant 0 : i32
    return %c0_i32, %c0_i32_0 : i32, i32
  }
  func.func @transform_6(%arg0: i32) -> (i32, i32) {
    %c0_i32 = arith.constant 0 : i32
    %c0_i32_0 = arith.constant 0 : i32
    %c0_i32_1 = arith.constant 0 : i32
    return %c0_i32, %c0_i32_0 : i32, i32
  }
  func.func @transform_7(%arg0: i32) -> (i32, i32) {
    %c0_i32 = arith.constant 0 : i32
    %c0_i32_0 = arith.constant 0 : i32
    %c0_i32_1 = arith.constant 0 : i32
    return %c0_i32, %c0_i32_0 : i32, i32
  }
  func.func @transform_8(%arg0: i32) -> (i32, i32) {
    %c0_i32 = arith.constant 0 : i32
    %c0_i32_0 = arith.constant 0 : i32
    %c0_i32_1 = arith.constant 0 : i32
    return %c0_i32, %c0_i32_0 : i32, i32
  }
  func.func @transform_9(%arg0: i32) -> (i32, i32) {
    %c0_i32 = arith.constant 0 : i32
    %c0_i32_0 = arith.constant 0 : i32
    %c0_i32_1 = arith.constant 0 : i32
    return %c0_i32, %c0_i32_0 : i32, i32
  }
  func.func @transform_10(%arg0: i32) -> (i32, i32) {
    %c0_i32 = arith.constant 0 : i32
    %c0_i32_0 = arith.constant 0 : i32
    %c0_i32_1 = arith.constant 0 : i32
    return %c0_i32, %c0_i32_0 : i32, i32
  }
  func.func @transform_11(%arg0: i32) -> (i32, i32) {
    %c0_i32 = arith.constant 0 : i32
    %c0_i32_0 = arith.constant 0 : i32
    return %c0_i32, %arg0 : i32, i32
  }
}

</mosaic_0001>

<bundles_post_ra>
// kernel: time_event_gan_forward.1
= control target key start
LH: loop header
LB: loop body
LE: loop exit
PB: predicated region body
PF: predicated region fallthrough
CT: control target
= control target key end

     0   :  { %vm82_vm0 = vcmask 130048   ;;  %v593_v2 = vmov 0   ;;  %v594_v30 = vmov 0.0   ;;  %vm595_vm1 = vmmov 0   ;;  %s820_s0 = inlined_call_operand.vmem [shape: f32[8,128], index: 0, kind: input, shape index: {}]   ;;  %s821_s1 = inlined_call_operand.vmem [shape: f32[8,128], index: 1, kind: input, shape index: {}]   ;;  %s822_s2 = inlined_call_operand.vmem [shape: bf16[32,16], index: 2, kind: input, shape index: {}]   ;;  %s823_s3 = inlined_call_operand.vmem [shape: f32[32,1], index: 3, kind: input, shape index: {}]   ;;  %s824_s10 = inlined_call_operand.<no memory space> [shape: f32[1,1], index: 10, kind: input, shape index: {}]   ;;  %s825_s6 = inlined_call_operand.vmem [shape: f32[48,1], index: 6, kind: input, shape index: {}]   ;;  %s826_s7 = inlined_call_operand.vmem [shape: f32[48,1], index: 7, kind: input, shape index: {}]   ;;  %s827_s8 = inlined_call_operand.vmem [shape: f32[32,1], index: 8, kind: input, shape index: {}]   ;;  %s828_s9 = inlined_call_operand.vmem [shape: f32[16,1], index: 9, kind: input, shape index: {}]   ;;  %s829_s5 = inlined_call_operand.vmem [shape: bf16[48,16], index: 5, kind: input, shape index: {}]   ;;  %s830_s4 = inlined_call_operand.vmem [shape: bf16[48,32], index: 4, kind: input, shape index: {}]   ;;  %s831_s11 = inlined_call_operand.vmem [shape: f32[1,128], index: 11, kind: output, shape index: {}]  }
   0x1   :  { %v659_v0 = vld [vmem:[%s820_s0] sm:$0xff]  ;;  %584 = vset.pattern.permute.xlu1 %v593_v2  ;;  %583 = vset.pattern.permute.xlu0 %v593_v2  ;;  %v16_v3 = vstv %s824_s10  ;;  %v50_v6 = vld [vmem:[%s823_s3 + $0x10] sm:$0xff]  ;;  %v586_v7 = vld [vmem:[%s822_s2 + $0x8] sm:$0xff]   ;;  %vm260_vm6 = vcmask 261120  }
   0x2   :  { %v664_v1 = vld [vmem:[%s821_s1] sm:$0xff]  ;;  %17 = vst [vmem:[#allocation2] sm:$0x1] %v16_v3  ;;  %64 = vperm.xlu1 %584, %v50_v6   ;;  %v51_v9 = vld [vmem:[%s823_s3 + $0x18] sm:$0xff]  ;;  %v49_v10 = vld [vmem:[%s823_s3 + $0x8] sm:$0xff]  ;;  %550 = vmatprep.subr.bf16.mxu1 %v594_v30 }
   0x3   :  { %v43_v4 = vpack.c.bf16 %v664_v1, %v659_v0  ;;  %v585_v5 = vld [vmem:[%s822_s2] sm:$0xff]   ;;  %v328_v11 = vld [vmem:[%s825_s6 + $0x8] sm:$0xff]  ;;  %v330_v13 = vld [vmem:[%s825_s6 + $0x18] sm:$0xff]  ;;  %552 = vmatprep.mubr.msk.bf16.mxu1 %vm595_vm1, %v594_v30 }
   0x4   :  { %546 = vmatprep.mubr.msk.bf16.mxu0 %vm82_vm0, %v585_v5  ;;  %v48_v8 = vld [vmem:[%s823_s3] sm:$0xff]  ;;  %v329_v14 = vld [vmem:[%s825_s6 + $0x10] sm:$0xff]  ;;  %v388_v15 = vld [vmem:[%s826_s7 + $0x8] sm:$0xff] }
   0x5   :  { %544 = vmatprep.subr.bf16.mxu0 %v43_v4  ;;  %54 = vperm.xlu0 %583, %v48_v8   ;;  %v327_v12 = vld [vmem:[%s825_s6] sm:$0xff]  ;;  %v389_v17 = vld [vmem:[%s826_s7 + $0x10] sm:$0xff]  ;;  %v390_v19 = vld [vmem:[%s826_s7 + $0x18] sm:$0xff] }
   0x6   :  { %545 = vmatpush3.bf16.msra.mxu0 %v43_v4  ;;  %69 = vperm.xlu1 %584, %v51_v9   ;;  %v387_v16 = vld [vmem:[%s826_s7] sm:$0xff]  ;;  %v332_v20 = vld [vmem:[%s825_s6 + $0x28] sm:$0xff]  ;;  %v442_v23 = vld [vmem:[%s827_s8 + $0x10] sm:$0xff] }
   0x7   :  { %v331_v18 = vld [vmem:[%s825_s6 + $0x20] sm:$0xff]  ;;  %v441_v21 = vld [vmem:[%s827_s8 + $0x8] sm:$0xff]  ;;  %v443_v25 = vld [vmem:[%s827_s8 + $0x18] sm:$0xff]  ;;  %564 = vmatprep.subr.bf16.mxu0 %v594_v30  ;;  %551 = vmatpush3.bf16.msra.mxu1 %v43_v4 }
   0x8   :  { %v440_v22 = vld [vmem:[%s827_s8] sm:$0xff]  ;;  %v392_v26 = vld [vmem:[%s826_s7 + $0x28] sm:$0xff]  ;;  %v591_v33 = vld [vmem:[%s829_s5 + $0x10] sm:$0xff]  }
   0x9   :  { %547 = vmatmul.mubr.msk.bf16.vlgmr.msra.gmra.mrb[0].mxu0 %vm82_vm0, %v586_v7  ;;  %59 = vperm.xlu0 %583, %v49_v10   ;;  %v391_v24 = vld [vmem:[%s826_s7 + $0x20] sm:$0xff]  ;;  %v479_v27 = vld [vmem:[%s828_s9 + $0x8] sm:$0xff] }
   0xa   :  { %340 = vperm.xlu1 %584, %v328_v11   ;;  %v478_v28 = vld [vmem:[%s828_s9] sm:$0xff]  ;;  %568 = vmatprep.mubr.msk.bf16.mxu0 %vm595_vm1, %v594_v30  ;;  %v589_v32 = vld [vmem:[%s829_s5 + $0x8] sm:$0xff]  }
   0xb   :  { %v500_v29 = vld [vmem:[#allocation2] sm:$0x1] }
   0xc   :  { %v587_v31 = vld [vmem:[%s829_s5] sm:$0xff]  }
   0xd   :  { %335 = vperm.xlu0 %583, %v327_v12   ;;  %553 = vmatmul.mubr.msk.bf16.vlgmr.msra.gmra.mrb[0].mxu1 %vm82_vm0, %v587_v31 }
   0xe   :  { %350 = vperm.xlu1 %584, %v330_v13   ;;  %556 = vmatprep.mubr.msk.bf16.mxu1 %vm595_vm1, %v594_v30 }
  0x11   :  { %345 = vperm.xlu0 %583, %v329_v14   ;;  %v588_v14 = vld [vmem:[%s830_s4] sm:$0xff]  }
  0x12   :  { %400 = vperm.xlu1 %584, %v388_v15  }
  0x15   :  { %395 = vperm.xlu0 %583, %v387_v16   ;;  %557 = vmatmul.mubr.msk.bf16.gmra.mrb[4].mxu1 %vm82_vm0, %v589_v32  ;;  %v590_v16 = vld [vmem:[%s830_s4 + $0x8] sm:$0xff]  }
  0x16   :  { %405 = vperm.xlu1 %584, %v389_v17   ;;  %560 = vmatprep.mubr.msk.bf16.mxu1 %vm595_vm1, %v594_v30  ;;  %v592_v17 = vld [vmem:[%s830_s4 + $0x10] sm:$0xff]  }
  0x19   :  { %355 = vperm.xlu0 %583, %v331_v18  }
  0x1a   :  { %410 = vperm.xlu1 %584, %v390_v19  }
  0x1d   :  { %360 = vperm.xlu0 %583, %v332_v20   ;;  %561 = vmatmul.mubr.msk.bf16.gmra.mrb[8].mxu1 %vm82_vm0, %v591_v33 }
  0x1e   :  { %451 = vperm.xlu1 %584, %v441_v21  }
  0x21   :  { %446 = vperm.xlu0 %583, %v440_v22  }
  0x22   :  { %456 = vperm.xlu1 %584, %v442_v23  }
  0x25   :  { %415 = vperm.xlu0 %583, %v391_v24  }
  0x26   :  { %461 = vperm.xlu1 %584, %v443_v25  }
  0x29   :  { %420 = vperm.xlu0 %583, %v392_v26  }
  0x2a   :  { %487 = vperm.xlu1 %584, %v479_v27  }
  0x2d   :  { %482 = vperm.xlu0 %583, %v478_v28  }
  0x31   :  { %503 = vperm.xlu0 %583, %v500_v29  }
  0x81   :  { %v65_v34 = vpop.permute.xlu1 %64 }
  0x84   :  { %v55_v36 = vpop.permute.xlu0 %54 }
  0x85   :  { %v70_v35 = vpop.permute.xlu1 %69 }
  0x88   :  { %v60_v38 = vpop.permute.xlu0 %59 }
  0x89   :  { %v767_v37 = vpop.permute.xlu1 %340 }
  0x8c   :  { %v771_v40 = vpop.permute.xlu0 %335 }
  0x8d   :  { %v769_v39 = vpop.permute.xlu1 %350 }
  0x90   :  { %v775_v42 = vpop.permute.xlu0 %345 }
  0x91   :  { %v773_v41 = vpop.permute.xlu1 %400 }
  0x94   :  { %v779_v44 = vpop.permute.xlu0 %395 }
  0x95   :  { %v777_v43 = vpop.permute.xlu1 %405 }
  0x98   :  { %v783_v46 = vpop.permute.xlu0 %355 }
  0x99   :  { %v781_v45 = vpop.permute.xlu1 %410 }
  0x9c   :  { %v785_v51 = vpop.permute.xlu0 %360 }
  0x9d   :  { %v452_v47 = vpop.permute.xlu1 %451 }
  0xa0   :  { %v447_v3 = vpop.permute.xlu0 %446 }
  0xa1   :  { %v457_v60 = vpop.permute.xlu1 %456 }
  0xa4   :  { %v416_v31 = vpop.permute.xlu0 %415 }
  0xa5   :  { %v462_v11 = vpop.permute.xlu1 %461 }
  0xdc   :  { %v548_v48 = vpop.f32.mrb[0].mxu0 }
  0xdd   :  { %v132_v49 = vadd.f32 %v548_v48, %v65_v34  ;;  %v123_v50 = vpop.f32.mrb[1].mxu0 }
  0xde   :  { %v124_v52 = vadd.f32 %v123_v50, %v55_v36  ;;  %v549_v53 = vpop.f32.mrb[2].mxu0 }
  0xdf   :  { %v144_v54 = vmul.f32 0.01, %v132_v49  ;;  %v135_v55 = vadd.f32 %v549_v53, %v70_v35  ;;  %v126_v56 = vpop.f32.mrb[3].mxu0  ;;  %vm140_vm2 = vcmp.gt.f32.partialorder %v132_v49, 0.0 }
  0xe0   :  { %vm138_vm3 = vcmp.gt.f32.partialorder %v124_v52, 0.0  ;;  %v142_v57 = vmul.f32 0.01, %v124_v52  ;;  %v127_v58 = vadd.f32 %v126_v56, %v60_v38  ;;  %v222_v18 = vpop.f32.mrb[0].mxu1 }
  0xe1   :  { %vm141_vm4 = vcmp.gt.f32.partialorder %v135_v55, 0.0  ;;  %v145_v59 = vmul.f32 0.01, %v135_v55  ;;  %v148_v63 = vsel %vm140_vm2, %v132_v49, %v144_v54  ;;  %v554_v19 = vpop.f32.mrb[1].mxu1 }
  0xe2   :  { %v146_v61 = vsel %vm138_vm3, %v124_v52, %v142_v57  ;;  %vm139_vm5 = vcmp.gt.f32.partialorder %v127_v58, 0.0  ;;  %v143_v62 = vmul.f32 0.01, %v127_v58  ;;  %v466_v9 = vmul.f32 %v457_v60, %v148_v63  ;;  %v225_v20 = vpop.f32.mrb[2].mxu1  ;;  %v488_v57 = vpop.permute.xlu1 %487 }
  0xe3   :  { %v149_v2 = vsel %vm141_vm4, %v135_v55, %v145_v59  ;;  %v464_v6 = vmul.f32 %v447_v3, %v146_v61  ;;  %v555_v21 = vpop.f32.mrb[3].mxu1 }
  0xe4   :  { %v151_v4 = vpack.c.bf16 %v149_v2, %v148_v63  ;;  %v147_v5 = vsel %vm139_vm5, %v127_v58, %v143_v62  ;;  %v467_v12 = vmul.f32 %v462_v11, %v149_v2 }
  0xe5   :  { %v150_v7 = vpack.c.bf16 %v147_v5, %v146_v61  ;;  %v465_v8 = vmul.f32 %v452_v47, %v147_v5  ;;  %v421_v47 = vpop.permute.xlu0 %420 }
  0xe7   :  { %v468_v10 = vadd.f32 %v465_v8, %v464_v6  ;;  %565 = vmatpush3.bf16.msra.mxu0 %v150_v7 }
  0xe8   :  { %566 = vmatprep.subr.bf16.mxu0 %v594_v30  ;;  %v230_v22 = vpop.f32.mrb[4].mxu1 }
  0xe9   :  { %v469_v13 = vadd.f32 %v468_v10, %v466_v9  ;;  %v558_v23 = vpop.f32.mrb[5].mxu1  ;;  %v483_v60 = vpop.permute.xlu0 %482 }
  0xea   :  { %v233_v24 = vpop.f32.mrb[6].mxu1  ;;  %v490_v5 = vmul.f32 %v483_v60, %v659_v0 }
  0xeb   :  { %v791_v15 = vadd.f32 %v469_v13, %v467_v12  ;;  %567 = vmatpush3.bf16.msra.mxu0 %v151_v4  ;;  %v559_v25 = vpop.f32.mrb[7].mxu1  ;;  %v491_v4 = vmul.f32 %v488_v57, %v664_v1 }
  0xed   :  { %v492_v10 = vadd.f32 %v491_v4, %v490_v5  ;;  %v471_v0 = vrot.slane %v791_v15, 4 }
  0xee   :  { %569 = vmatmul.mubr.msk.bf16.vlgmr.msra.gmra.mrb[4].mxu0 %vm260_vm6, %v588_v14 }
  0xef   :  { %572 = vmatprep.mubr.msk.bf16.mxu0 %vm595_vm1, %v594_v30  ;;  %v472_v21 = vadd.f32 %v471_v0, %v791_v15 }
  0xf0   :  { %v238_v26 = vpop.f32.mrb[8].mxu1 }
  0xf1   :  { %v562_v27 = vpop.f32.mrb[9].mxu1  ;;  %v473_v25 = vrot.slane %v472_v21, 2 }
  0xf2   :  { %v241_v28 = vpop.f32.mrb[10].mxu1 }
  0xf3   :  { %v563_v29 = vpop.f32.mrb[11].mxu1 }
  0xf4   :  { %v506_v29 = vlaneseq }
  0xf6   :  { %573 = vmatmul.mubr.msk.bf16.gmra.mrb[8].mxu0 %vm260_vm6, %v590_v16 }
  0xf7   :  { %576 = vmatprep.mubr.msk.bf16.mxu0 %vm595_vm1, %v594_v30 }
  0xfe   :  { %577 = vmatmul.mubr.msk.bf16.gmra.mrb[12].mxu0 %vm260_vm6, %v592_v17 }
 0x1c1   :  { %v304_v32 = vpop.f32.mrb[4].mxu0 }
 0x1c2   :  { %v305_v30 = vadd.f32 %v304_v32, %v222_v18  ;;  %v570_v33 = vpop.f32.mrb[5].mxu0  ;;  %v493_v18 = vrot.slane %v492_v10, 4  ;;  %v474_v32 = vadd.f32 %v473_v25, %v472_v21 }
 0x1c3   :  { %v307_v34 = vpop.f32.mrb[6].mxu0 }
 0x1c4   :  { %v363_v35 = vadd.f32 %v771_v40, %v305_v30  ;;  %v308_v36 = vadd.f32 %v307_v34, %v225_v20  ;;  %v571_v38 = vpop.f32.mrb[7].mxu0  ;;  %v494_v23 = vadd.f32 %v493_v18, %v492_v10  ;;  %v507_v34 = vshrl.u32 %v506_v29, 7 }
 0x1c6   :  { %vm369_vm7 = vcmp.gt.f32.partialorder %v363_v35, 0.0  ;;  %v375_v48 = vmul.f32 0.01, %v363_v35  ;;  %v364_v49 = vadd.f32 %v767_v37, %v308_v36  ;;  %v495_v27 = vrot.slane %v494_v23, 2 }
 0x1c7   :  { %v508_v15 = vsub.s32 0, %v507_v34 }
 0x1c8   :  { %v381_v50 = vsel %vm369_vm7, %v363_v35, %v375_v48  ;;  %vm370_vm8 = vcmp.gt.f32.partialorder %v364_v49, 0.0  ;;  %v376_v52 = vmul.f32 0.01, %v364_v49  ;;  %v496_v33 = vadd.f32 %v495_v27, %v494_v23 }
 0x1c9   :  { %v312_v53 = vpop.f32.mrb[8].mxu0  ;;  %v423_v58 = vmul.f32 %v779_v44, %v381_v50  ;;  %v475_v35 = vrot.slane %v474_v32, 1  ;;  %v504_v50 = vpop.permute.xlu0 %503 }
 0x1ca   :  { %v382_v54 = vsel %vm370_vm8, %v364_v49, %v376_v52  ;;  %v313_v55 = vadd.f32 %v312_v53, %v230_v22  ;;  %v574_v56 = vpop.f32.mrb[9].mxu0  ;;  %v497_v38 = vrot.slane %v496_v33, 1  ;;  %v509_v53 = vrot.slane %v504_v50, %v508_v15 }
 0x1cb   :  { %v424_v59 = vmul.f32 %v773_v41, %v382_v54  ;;  %v315_v40 = vpop.f32.mrb[10].mxu0 }
 0x1cc   :  { %v365_v61 = vadd.f32 %v775_v42, %v313_v55  ;;  %v316_v62 = vadd.f32 %v315_v40, %v233_v24  ;;  %v575_v63 = vpop.f32.mrb[11].mxu0  ;;  %v498_v52 = vadd.f32 %v497_v38, %v496_v33 }
 0x1cd   :  { %v429_v2 = vadd.f32 %v424_v59, %v423_v58 }
 0x1ce   :  { %vm371_vm9 = vcmp.gt.f32.partialorder %v365_v61, 0.0  ;;  %v377_v37 = vmul.f32 0.01, %v365_v61  ;;  %v366_v3 = vadd.f32 %v769_v39, %v316_v62 }
 0x1d0   :  { %v383_v6 = vsel %vm371_vm9, %v365_v61, %v377_v37  ;;  %vm372_vm10 = vcmp.gt.f32.partialorder %v366_v3, 0.0  ;;  %v378_v44 = vmul.f32 0.01, %v366_v3 }
 0x1d1   :  { %v425_v41 = vmul.f32 %v777_v43, %v383_v6  ;;  %v320_v7 = vpop.f32.mrb[12].mxu0 }
 0x1d2   :  { %v384_v8 = vsel %vm372_vm10, %v366_v3, %v378_v44  ;;  %v321_v9 = vadd.f32 %v320_v7, %v238_v26  ;;  %v578_v42 = vpop.f32.mrb[13].mxu0 }
 0x1d3   :  { %v430_v11 = vadd.f32 %v429_v2, %v425_v41  ;;  %v426_v12 = vmul.f32 %v781_v45, %v384_v8  ;;  %v323_v13 = vpop.f32.mrb[14].mxu0 }
 0x1d4   :  { %v367_v39 = vadd.f32 %v783_v46, %v321_v9  ;;  %v324_v14 = vadd.f32 %v323_v13, %v241_v28  ;;  %v579_v1 = vpop.f32.mrb[15].mxu0 }
 0x1d5   :  { %v431_v16 = vadd.f32 %v430_v11, %v426_v12 }
 0x1d6   :  { %vm373_vm11 = vcmp.gt.f32.partialorder %v367_v39, 0.0  ;;  %v379_v17 = vmul.f32 0.01, %v367_v39  ;;  %v368_v43 = vadd.f32 %v785_v51, %v324_v14 }
 0x1d8   :  { %v385_v19 = vsel %vm373_vm11, %v367_v39, %v379_v17  ;;  %vm374_vm12 = vcmp.gt.f32.partialorder %v368_v43, 0.0  ;;  %v380_v20 = vmul.f32 0.01, %v368_v43 }
 0x1d9   :  { %v427_v22 = vmul.f32 %v416_v31, %v385_v19  ;;  %v476_v31 = vadd.f32 %v475_v35, %v474_v32 }
 0x1da   :  { %v386_v45 = vsel %vm374_vm12, %v368_v43, %v380_v20 }
 0x1db   :  { %v432_v24 = vadd.f32 %v431_v16, %v427_v22  ;;  %v428_v46 = vmul.f32 %v421_v47, %v386_v45 }
 0x1dd   :  { %v433_v26 = vadd.f32 %v432_v24, %v428_v46 }
 0x1df   :  { %v434_v28 = vrot.slane %v433_v26, 4 }
 0x1e1   :  { %v435_v30 = vadd.f32 %v434_v28, %v433_v26 }
 0x1e3   :  { %v436_v51 = vrot.slane %v435_v30, 2 }
 0x1e5   :  { %v437_v36 = vadd.f32 %v436_v51, %v435_v30 }
 0x1e7   :  { %v438_v48 = vrot.slane %v437_v36, 1 }
 0x1e9   :  { %v439_v49 = vadd.f32 %v438_v48, %v437_v36 }
 0x1eb   :  { %v477_v47 = vadd.f32 %v476_v31, %v439_v49 }
 0x1ed   :  { %v499_v54 = vadd.f32 %v498_v52, %v477_v47 }
 0x1ef   :  { %v510_v55 = vadd.f32 %v509_v53, %v499_v54 }
 0x1f1   :  { %511 = vst [vmem:[%s831_s11] sm:$0x1] %v510_v55 }

</bundles_post_ra>
